<compile_context>
chip_gen: v7x
topology: tpu7x:2x2x1
jax: 0.10.0
libtpu: 0.0.40
codegen_flags: <defaults>
</compile_context>

<pallas_src>
import math
import jax
import jax.numpy as jnp
from jax import lax
from jax.experimental import pallas as pl
from jax.experimental.pallas import tpu as pltpu


def _round_up(x, m):
    return ((x + m - 1) // m) * m


def _dora_kernel(x_ref, w_ref, bias_ref, a_ref, b_ref, o_ref, acc_ref, xa_ref):
    k = pl.program_id(2)

    @pl.when(k == 0)
    def _():
        acc_ref[...] = jnp.zeros_like(acc_ref)
        xa_ref[...] = jnp.zeros_like(xa_ref)

    x = x_ref[...]                                            # (tm, tk)

    # Frozen-linear partial: x_tile @ w_tile^T   (w tile is (tn, tk)).
    acc_ref[...] += lax.dot_general(
        x, w_ref[...],
        dimension_numbers=(((1,), (1,)), ((), ())),
        preferred_element_type=jnp.float32)

    # LoRA partial: accumulate x_tile @ (A * c * scaling)_tile into (tm, r_pad).
    xa_ref[...] += jnp.dot(x, a_ref[...], preferred_element_type=jnp.float32)

    @pl.when(k == pl.num_programs(2) - 1)
    def _():
        lora = jnp.dot(xa_ref[...], b_ref[...],
                       preferred_element_type=jnp.float32)    # (tm, tn)
        o_ref[...] = (acc_ref[...] + lora + bias_ref[...]).astype(o_ref.dtype)


def dora_linear_forward(x, w, bias, A, B, c, lora_scaling,
                        *, tm=256, tn=256, tk=512):
    """
    x    : (batch, seq, in_features)
    w    : (out_features, in_features)   -- frozen linear weight (PyTorch layout)
    bias : (out_features,)
    A    : (in_features, rank)
    B    : (rank, out_features)
    c    : (rank,)
    """
    batch, seq, in_f = x.shape
    out_f = w.shape[0]
    rank = A.shape[1]
    M = batch * seq
    dtype = x.dtype

    # Fold per-rank scale c and lora_scaling into A (removes in-kernel VPU muls).
    A_scaled = A * (c * lora_scaling)[None, :]

    # Pad rank to f32 sublane multiple.
    r_pad = max(8, _round_up(rank, 8))
    if r_pad != rank:
        A_scaled = jnp.pad(A_scaled, ((0, 0), (0, r_pad - rank)))
        B = jnp.pad(B, ((0, r_pad - rank), (0, 0)))

    # Adaptive tile sizes: lane-dense N/K tiles (mult. of 128), M mult. of 8.
    tm = min(tm, _round_up(M, 8))
    tn = min(tn, _round_up(out_f, 128))
    tk = min(tk, _round_up(in_f, 128))

    Mp = _round_up(M, tm)
    Np = _round_up(out_f, tn)
    Kp = _round_up(in_f, tk)

    x2d = x.reshape(M, in_f)
    if (Mp, Kp) != (M, in_f):
        x2d = jnp.pad(x2d, ((0, Mp - M), (0, Kp - in_f)))
    w_p = w
    if (Np, Kp) != (out_f, in_f):
        w_p = jnp.pad(w, ((0, Np - out_f), (0, Kp - in_f)))
    if Kp != in_f:
        A_scaled = jnp.pad(A_scaled, ((0, Kp - in_f), (0, 0)))
    B_p = B if Np == out_f else jnp.pad(B, ((0, 0), (0, Np - out_f)))
    bias2d = bias.reshape(1, out_f)
    if Np != out_f:
        bias2d = jnp.pad(bias2d, ((0, 0), (0, Np - out_f)))

    grid = (Mp // tm, Np // tn, Kp // tk)

    elem = jnp.dtype(dtype).itemsize
    flops = 2 * Mp * Np * Kp + 2 * Mp * r_pad * (Kp + Np)
    bytes_accessed = elem * (Mp * Kp + Np * Kp + Kp * r_pad + r_pad * Np
                             + Np + Mp * Np)

    out2d = pl.pallas_call(
        _dora_kernel,
        out_shape=jax.ShapeDtypeStruct((Mp, Np), dtype),
        grid=grid,
        in_specs=[
            pl.BlockSpec((tm, tk), lambda i, j, k: (i, k)),      # x
            pl.BlockSpec((tn, tk), lambda i, j, k: (j, k)),      # w (N, K) layout
            pl.BlockSpec((1, tn), lambda i, j, k: (0, j)),       # bias
            pl.BlockSpec((tk, r_pad), lambda i, j, k: (k, 0)),   # A * c * scaling
            pl.BlockSpec((r_pad, tn), lambda i, j, k: (0, j)),   # B
        ],
        out_specs=pl.BlockSpec((tm, tn), lambda i, j, k: (i, j)),
        scratch_shapes=[
            pltpu.VMEM((tm, tn), jnp.float32),     # output accumulator
            pltpu.VMEM((tm, r_pad), jnp.float32),  # x @ A accumulator
        ],
        compiler_params=pltpu.CompilerParams(
            dimension_semantics=("parallel", "parallel", "arbitrary")),
        cost_estimate=pl.CostEstimate(flops=flops, transcendentals=0,
                                      bytes_accessed=bytes_accessed),
    )(x2d, w_p, bias2d, A_scaled, B_p)

    return out2d[:M, :out_f].reshape(batch, seq, out_f)


def _kaiming_uniform(key, shape, fan_in):
    # matches nn.init.kaiming_uniform_(tensor, a=sqrt(5)): bound = 1/sqrt(fan_in)
    bound = 1.0 / math.sqrt(fan_in)
    return jax.random.uniform(key, shape, jnp.float32, -bound, bound)


if __name__ == "__main__":
    # config: adaptive_lora_start_rank=4, lora_alpha=8, lora_dropout=0.0
    batch, seq = 2, 8
    in_features, out_features, rank = 32, 32, 4
    lora_alpha = 8.0
    lora_scaling = lora_alpha / rank

    key = jax.random.PRNGKey(0)
    kx, kw, kb, kA, kB = jax.random.split(key, 5)

    x = jax.random.normal(kx, (batch, seq, in_features), jnp.float32)

    # frozen nn.Linear params (deterministic synthetic init)
    w = _kaiming_uniform(kw, (out_features, in_features), fan_in=in_features)
    bias = _kaiming_uniform(kb, (out_features,), fan_in=in_features)

    # DoRA params: PyTorch kaiming_uniform_ uses fan_in = tensor.size(1)
    A = _kaiming_uniform(kA, (in_features, rank), fan_in=rank)
    B = _kaiming_uniform(kB, (rank, out_features), fan_in=out_features)
    c = jnp.ones((rank,), jnp.float32)

    out = dora_linear_forward(x, w, bias, A, B, c, lora_scaling)
    out = jax.block_until_ready(out)

    # reference check in plain JAX
    hidden_ref = x @ w.T + bias
    lora_ref = ((x @ A) * c) @ B * lora_scaling
    ref = hidden_ref + lora_ref
    assert out.shape == (batch, seq, out_features)
    assert jnp.allclose(out, ref, atol=1e-5, rtol=1e-5)

    print("KERNEL_OK")
</pallas_src>

<mosaic_0001>
module attributes {stable_mosaic.version = 11 : i64} {
  func.func @_dora_kernel(%arg0: i32, %arg1: i32, %arg2: i32, %arg3: memref<16x128xf32, #tpu.memory_space<vmem>>, %arg4: memref<128x128xf32, #tpu.memory_space<vmem>>, %arg5: memref<1x128xf32, #tpu.memory_space<vmem>>, %arg6: memref<128x8xf32, #tpu.memory_space<vmem>>, %arg7: memref<8x128xf32, #tpu.memory_space<vmem>>, %arg8: memref<16x128xf32, #tpu.memory_space<vmem>>, %arg9: memref<16x128xf32, #tpu.memory_space<vmem>>, %arg10: memref<16x8xf32, #tpu.memory_space<vmem>>) attributes {dimension_semantics = [#tpu.dimension_semantics<parallel>, #tpu.dimension_semantics<parallel>, #tpu.dimension_semantics<arbitrary>], iteration_bounds = array<i64: 1, 1, 1>, scalar_prefetch = 0 : i64, scratch_operands = 2 : i64, tpu.core_type = #tpu.core_type<tc>, window_params = [{transform_indices = @transform_0, window_bounds = array<i64: 16, 128>}, {transform_indices = @transform_1, window_bounds = array<i64: 128, 128>}, {transform_indices = @transform_2, window_bounds = array<i64: 1, 128>}, {transform_indices = @transform_3, window_bounds = array<i64: 128, 8>}, {transform_indices = @transform_4, window_bounds = array<i64: 8, 128>}, {transform_indices = @transform_5, window_bounds = array<i64: 16, 128>}]} {
    %c0_i32 = arith.constant 0 : i32
    %0 = arith.cmpi eq, %arg2, %c0_i32 : i32
    %1 = arith.extui %0 : i1 to i32
    %c0_i32_0 = arith.constant 0 : i32
    %2 = arith.cmpi ne, %1, %c0_i32_0 : i32
    scf.if %2 {
      %cst_17 = arith.constant 0.000000e+00 : f32
      %17 = vector.broadcast %cst_17 : f32 to vector<16x128xf32>
      %c0_18 = arith.constant 0 : index
      %c0_19 = arith.constant 0 : index
      %18 = vector.load %arg9[%c0_18, %c0_19] : memref<16x128xf32, #tpu.memory_space<vmem>>, vector<16x128xf32>
      tpu.vector_store %arg9[%c0_18, %c0_19], %17 {strides = array<i32>} : memref<16x128xf32, #tpu.memory_space<vmem>>, vector<16x128xf32>,
      %cst_20 = arith.constant 0.000000e+00 : f32
      %19 = vector.broadcast %cst_20 : f32 to vector<16x8xf32>
      %c0_21 = arith.constant 0 : index
      %c0_22 = arith.constant 0 : index
      %20 = vector.load %arg10[%c0_21, %c0_22] : memref<16x8xf32, #tpu.memory_space<vmem>>, vector<16x8xf32>
      tpu.vector_store %arg10[%c0_21, %c0_22], %19 {strides = array<i32>} : memref<16x8xf32, #tpu.memory_space<vmem>>, vector<16x8xf32>,
    } else {
    }
    %c0 = arith.constant 0 : index
    %c0_1 = arith.constant 0 : index
    %3 = vector.load %arg3[%c0, %c0_1] : memref<16x128xf32, #tpu.memory_space<vmem>>, vector<16x128xf32>
    %c0_2 = arith.constant 0 : index
    %c0_3 = arith.constant 0 : index
    %4 = vector.load %arg9[%c0_2, %c0_3] : memref<16x128xf32, #tpu.memory_space<vmem>>, vector<16x128xf32>
    %c0_4 = arith.constant 0 : index
    %c0_5 = arith.constant 0 : index
    %5 = vector.load %arg4[%c0_4, %c0_5] : memref<128x128xf32, #tpu.memory_space<vmem>>, vector<128x128xf32>
    %cst = arith.constant dense<0.000000e+00> : vector<16x128xf32>
    %6 = tpu.matmul %3, %5, %cst {dimension_numbers = #tpu.dot_dimension_numbers<[1], [1], [0], [0], [0, 0, 1, 0], [], []>} : vector<16x128xf32>, vector<128x128xf32>, vector<16x128xf32> -> vector<16x128xf32>
    %7 = arith.addf %4, %6 : vector<16x128xf32>
    %c0_6 = arith.constant 0 : index
    %c0_7 = arith.constant 0 : index
    %8 = vector.load %arg9[%c0_6, %c0_7] : memref<16x128xf32, #tpu.memory_space<vmem>>, vector<16x128xf32>
    tpu.vector_store %arg9[%c0_6, %c0_7], %7 {strides = array<i32>} : memref<16x128xf32, #tpu.memory_space<vmem>>, vector<16x128xf32>,
    %c0_8 = arith.constant 0 : index
    %c0_9 = arith.constant 0 : index
    %9 = vector.load %arg10[%c0_8, %c0_9] : memref<16x8xf32, #tpu.memory_space<vmem>>, vector<16x8xf32>
    %c0_10 = arith.constant 0 : index
    %c0_11 = arith.constant 0 : index
    %10 = vector.load %arg6[%c0_10, %c0_11] : memref<128x8xf32, #tpu.memory_space<vmem>>, vector<128x8xf32>
    %cst_12 = arith.constant dense<0.000000e+00> : vector<16x8xf32>
    %11 = tpu.matmul %3, %10, %cst_12 {dimension_numbers = #tpu.dot_dimension_numbers<[1], [0], [0], [1], [0, 0, 1, 1], [], []>} : vector<16x128xf32>, vector<128x8xf32>, vector<16x8xf32> -> vector<16x8xf32>
    %12 = arith.addf %9, %11 : vector<16x8xf32>
    %c0_13 = arith.constant 0 : index
    %c0_14 = arith.constant 0 : index
    %13 = vector.load %arg10[%c0_13, %c0_14] : memref<16x8xf32, #tpu.memory_space<vmem>>, vector<16x8xf32>
    tpu.vector_store %arg10[%c0_13, %c0_14], %12 {strides = array<i32>} : memref<16x8xf32, #tpu.memory_space<vmem>>, vector<16x8xf32>,
    %c0_i32_15 = arith.constant 0 : i32
    %14 = arith.cmpi eq, %arg2, %c0_i32_15 : i32
    %15 = arith.extui %14 : i1 to i32
    %c0_i32_16 = arith.constant 0 : i32
    %16 = arith.cmpi ne, %15, %c0_i32_16 : i32
    scf.if %16 {
      %c0_17 = arith.constant 0 : index
      %c0_18 = arith.constant 0 : index
      %17 = vector.load %arg10[%c0_17, %c0_18] : memref<16x8xf32, #tpu.memory_space<vmem>>, vector<16x8xf32>
      %c0_19 = arith.constant 0 : index
      %c0_20 = arith.constant 0 : index
      %18 = vector.load %arg7[%c0_19, %c0_20] : memref<8x128xf32, #tpu.memory_space<vmem>>, vector<8x128xf32>
      %cst_21 = arith.constant dense<0.000000e+00> : vector<16x128xf32>
      %19 = tpu.matmul %17, %18, %cst_21 {dimension_numbers = #tpu.dot_dimension_numbers<[1], [0], [0], [1], [0, 0, 1, 1], [], []>} : vector<16x8xf32>, vector<8x128xf32>, vector<16x128xf32> -> vector<16x128xf32>
      %c0_22 = arith.constant 0 : index
      %c0_23 = arith.constant 0 : index
      %20 = vector.load %arg9[%c0_22, %c0_23] : memref<16x128xf32, #tpu.memory_space<vmem>>, vector<16x128xf32>
      %21 = arith.addf %20, %19 : vector<16x128xf32>
      %c0_24 = arith.constant 0 : index
      %c0_25 = arith.constant 0 : index
      %22 = vector.load %arg5[%c0_24, %c0_25] : memref<1x128xf32, #tpu.memory_space<vmem>>, vector<1x128xf32>
      %23 = vector.broadcast %22 : vector<1x128xf32> to vector<16x128xf32>
      %24 = arith.addf %21, %23 : vector<16x128xf32>
      %c0_26 = arith.constant 0 : index
      %c0_27 = arith.constant 0 : index
      %25 = vector.load %arg8[%c0_26, %c0_27] : memref<16x128xf32, #tpu.memory_space<vmem>>, vector<16x128xf32>
      tpu.vector_store %arg8[%c0_26, %c0_27], %24 {strides = array<i32>} : memref<16x128xf32, #tpu.memory_space<vmem>>, vector<16x128xf32>,
    } else {
    }
    return
  }
  func.func @transform_0(%arg0: i32, %arg1: i32, %arg2: i32) -> (i32, i32) {
    %c0_i32 = arith.constant 0 : i32
    return %arg0, %arg2 : i32, i32
  }
  func.func @transform_1(%arg0: i32, %arg1: i32, %arg2: i32) -> (i32, i32) {
    %c0_i32 = arith.constant 0 : i32
    return %arg1, %arg2 : i32, i32
  }
  func.func @transform_2(%arg0: i32, %arg1: i32, %arg2: i32) -> (i32, i32) {
    %c0_i32 = arith.constant 0 : i32
    %c0_i32_0 = arith.constant 0 : i32
    return %c0_i32, %arg1 : i32, i32
  }
  func.func @transform_3(%arg0: i32, %arg1: i32, %arg2: i32) -> (i32, i32) {
    %c0_i32 = arith.constant 0 : i32
    %c0_i32_0 = arith.constant 0 : i32
    return %arg2, %c0_i32 : i32, i32
  }
  func.func @transform_4(%arg0: i32, %arg1: i32, %arg2: i32) -> (i32, i32) {
    %c0_i32 = arith.constant 0 : i32
    %c0_i32_0 = arith.constant 0 : i32
    return %c0_i32, %arg1 : i32, i32
  }
  func.func @transform_5(%arg0: i32, %arg1: i32, %arg2: i32) -> (i32, i32) {
    %c0_i32 = arith.constant 0 : i32
    return %arg0, %arg1 : i32, i32
  }
}

</mosaic_0001>

<bundles_post_ra>
// kernel: tpu_custom_call.1
= control target key start
LH: loop header
LB: loop body
LE: loop exit
PB: predicated region body
PF: predicated region fallthrough
CT: control target
= control target key end

     0   :  { %10 = vsyncpa [#allocation5], 0  ;;  %s769_s0 = inlined_call_operand.hbm [shape: f32[16,128], index: 0, kind: input, shape index: {}]   ;;  %s770_s1 = inlined_call_operand.vmem [shape: f32[128,128], index: 1, kind: input, shape index: {}]   ;;  %s771_s2 = inlined_call_operand.vmem [shape: f32[1,128], index: 2, kind: input, shape index: {}]   ;;  %s772_s3 = inlined_call_operand.vmem [shape: f32[128,8], index: 3, kind: input, shape index: {}]   ;;  %s773_s4 = inlined_call_operand.vmem [shape: f32[8,128], index: 4, kind: input, shape index: {}]   ;;  %s774_s5 = inlined_call_operand.hbm [shape: f32[16,128], index: 5, kind: output, shape index: {}]  }
   0x1   :  { %11 = vsyncpa [#allocation6], 0  ;;  %s596_s18 = smov [#allocation4]   ;;  %s548_s22 = scalar_lea.hbm %s769_s0, 256 }
   0x2   :  { %s17_s19 = sshll.u32 %s596_s18, 4  ;;  %p549_p0 = scmp.ne.s32.totalorder %s769_s0, %s548_s22  ;;  %s18_s19 = int_to_ptr.vmem [resolvable:$true] %s17_s19 }
   0x3   :  { %p552_p1 = scmp.lt.u32.totalorder %s548_s22, %s769_s0 }
   0x5   :  { %p554_p2 = pnand %p552_p1, %p549_p0 }
   0x7   :  { %557 = shalt.err (!%p554_p2)
}
   0x8   :  { %s558_s27 = scalar_lea.vmem %s18_s19, 256  ;;  %p563_p4 = scmp.lt.s32.totalorder %s18_s19, %s18_s19 }
   0x9   :  { %p559_p3 = scmp.ne.s32.totalorder %s18_s19, %s558_s27  ;;  %p564_p5 = scmp.lt.s32.totalorder %s558_s27, %s558_s27 }
   0xb   :  { %p565_p6 = por %p564_p5, %p563_p4 }
   0xd   :  { %p566_p7 = pnand %p565_p6, %p559_p3 }
   0xf   :  { %569 = shalt.err (!%p566_p7)
}
  0x10   :  { %s597_s28 = smov 128   ;;  %s598_s29 = smov 8  }
  0x11   :  { %23 = dma.hbm_to_vmem [thread:$0]  %s769_s0, 256, %s18_s19, [#allocation5], %s597_s28, %s597_s28, %s598_s29  }
  0x12   :  { %592 = dma.done.wait [#allocation5], 256  }
  0x13   :  { %593 = vsyncadd [#allocation5], 4294967040  ;;  %vm41_vm0 = vcmask 64512   ;;  %v599_v0 = vmov 0.0   ;;  %v145_v1 = vld [vmem:[%s772_s3] sm:$0xff]  ;;  %v146_v2 = vld [vmem:[%s772_s3 + $0x8] sm:$0xff] }
  0x14   :  { %43 = vst.msk [vmem:[#allocation3 + $0x8] sm:$0xff] %vm41_vm0, %v599_v0  ;;  %42 = vst.msk [vmem:[#allocation3] sm:$0xff] %vm41_vm0, %v599_v0  ;;  %v147_v3 = vld [vmem:[%s772_s3 + $0x10] sm:$0xff]  ;;  %v509_v4 = vpack.c.bf16 %v146_v2, %v145_v1  ;;  %v148_v5 = vld [vmem:[%s772_s3 + $0x18] sm:$0xff]  ;;  %s600_s23 = smov [#allocation7]  }
  0x15   :  { %v513_v6 = vpack.c.bf16 %v148_v5, %v147_v3  ;;  %v149_v7 = vld [vmem:[%s772_s3 + $0x20] sm:$0xff]  ;;  %v150_v8 = vld [vmem:[%s772_s3 + $0x28] sm:$0xff]  ;;  %v151_v10 = vld [vmem:[%s772_s3 + $0x30] sm:$0xff]  ;;  %s348_s24 = sshll.u32 %s600_s23, 4  ;;  %s349_s24 = int_to_ptr.vmem [resolvable:$true] %s348_s24 }
  0x16   :  { %510 = vmatprep.subr.bf16.mxu1 %v509_v4  ;;  %v517_v9 = vpack.c.bf16 %v150_v8, %v149_v7  ;;  %v152_v11 = vld [vmem:[%s772_s3 + $0x38] sm:$0xff]  ;;  %v44_v12 = vld [vmem:[#allocation4] sm:$0xff]  ;;  %v48_v13 = vld [vmem:[%s770_s1] sm:$0xff]  ;;  %s570_s25 = scalar_lea.vmem %s349_s24, 256  ;;  %p575_p9 = scmp.lt.s32.totalorder %s349_s24, %s349_s24 }
  0x17   :  { %512 = vmatpush3.bf16.msra.mxu1 %v509_v4  ;;  %469 = vmatprep.mubr.f32.mxu1 %v44_v12  ;;  %v49_v14 = vld [vmem:[%s770_s1 + $0x8] sm:$0xff]  ;;  %v50_v15 = vld [vmem:[%s770_s1 + $0x10] sm:$0xff]  ;;  %v51_v17 = vld [vmem:[%s770_s1 + $0x18] sm:$0xff]  ;;  %v521_v19 = vpack.c.bf16 %v152_v11, %v151_v10  ;;  %p571_p8 = scmp.ne.s32.totalorder %s349_s24, %s570_s25  ;;  %p576_p10 = scmp.lt.s32.totalorder %s570_s25, %s570_s25 }
  0x18   :  { %514 = vmatprep.subr.bf16.mxu1 %v513_v6  ;;  %434 = vmatprep.mubr.f32.mxu0 %v44_v12  ;;  %v477_v16 = vpack.c.bf16 %v49_v14, %v48_v13  ;;  %v481_v18 = vpack.c.bf16 %v51_v17, %v50_v15  ;;  %v153_v20 = vld [vmem:[%s772_s3 + $0x40] sm:$0xff]  ;;  %v154_v21 = vld [vmem:[%s772_s3 + $0x48] sm:$0xff]  ;;  %v155_v25 = vld [vmem:[%s772_s3 + $0x50] sm:$0xff] }
  0x19   :  { %v52_v22 = vld [vmem:[%s770_s1 + $0x20] sm:$0xff]  ;;  %v53_v23 = vld [vmem:[%s770_s1 + $0x28] sm:$0xff]  ;;  %v525_v24 = vpack.c.bf16 %v154_v21, %v153_v20  ;;  %v156_v26 = vld [vmem:[%s772_s3 + $0x58] sm:$0xff]  ;;  %p577_p11 = por %p576_p10, %p575_p9 }
  0x1a   :  { %478 = vmatprep.subr.bf16.mxu0 %v477_v16  ;;  %v485_v27 = vpack.c.bf16 %v53_v23, %v52_v22  ;;  %v529_v28 = vpack.c.bf16 %v156_v26, %v155_v25  ;;  %v157_v29 = vld [vmem:[%s772_s3 + $0x60] sm:$0xff]  ;;  %v158_v30 = vld [vmem:[%s772_s3 + $0x68] sm:$0xff]  ;;  %v54_v31 = vld [vmem:[%s770_s1 + $0x30] sm:$0xff] }
  0x1b   :  { %516 = vmatpush3.bf16.msra.mxu1 %v513_v6  ;;  %480 = vmatpush3.bf16.xpose.msra.mxu0 %v477_v16  ;;  %v55_v32 = vld [vmem:[%s770_s1 + $0x38] sm:$0xff]  ;;  %v533_v33 = vpack.c.bf16 %v158_v30, %v157_v29  ;;  %v159_v34 = vld [vmem:[%s772_s3 + $0x70] sm:$0xff]  ;;  %v56_v38 = vld [vmem:[%s770_s1 + $0x40] sm:$0xff]  ;;  %p578_p12 = pnand %p577_p11, %p571_p8 }
  0x1c   :  { %518 = vmatprep.subr.bf16.mxu1 %v517_v9  ;;  %482 = vmatprep.subr.bf16.mxu0 %v481_v18  ;;  %v160_v35 = vld [vmem:[%s772_s3 + $0x78] sm:$0xff]  ;;  %v489_v36 = vpack.c.bf16 %v55_v32, %v54_v31  ;;  %v57_v39 = vld [vmem:[%s770_s1 + $0x48] sm:$0xff]  ;;  %v58_v42 = vld [vmem:[%s770_s1 + $0x50] sm:$0xff] }
  0x1d   :  { %v537_v37 = vpack.c.bf16 %v160_v35, %v159_v34  ;;  %v493_v40 = vpack.c.bf16 %v57_v39, %v56_v38  ;;  %v45_v41 = vld [vmem:[#allocation4 + $0x8] sm:$0xff]  ;;  %v60_v45 = vld [vmem:[%s770_s1 + $0x60] sm:$0xff]  ;;  %v61_v46 = vld [vmem:[%s770_s1 + $0x68] sm:$0xff] }
  0x1e   :  { %v59_v43 = vld [vmem:[%s770_s1 + $0x58] sm:$0xff]  ;;  %v501_v47 = vpack.c.bf16 %v61_v46, %v60_v45  ;;  %v62_v48 = vld [vmem:[%s770_s1 + $0x70] sm:$0xff]  ;;  %v246_v51 = vld [vmem:[%s773_s4] sm:$0xff] }
  0x1f   :  { %520 = vmatpush3.bf16.msra.mxu1 %v517_v9  ;;  %v497_v44 = vpack.c.bf16 %v59_v43, %v58_v42  ;;  %v63_v49 = vld [vmem:[%s770_s1 + $0x78] sm:$0xff]  ;;  %v144_v52 = vld [vmem:[#allocation3 + $0x8] sm:$0xff]  ;;  %v143_v53 = vld [vmem:[#allocation3] sm:$0xff] }
  0x20   :  { %522 = vmatprep.subr.bf16.mxu1 %v521_v19  ;;  %v505_v50 = vpack.c.bf16 %v63_v49, %v62_v48  ;;  %v362_v63 = vld [vmem:[%s771_s2] ss:$0 sm:$0xff] }
  0x23   :  { %524 = vmatpush3.bf16.msra.mxu1 %v521_v19  ;;  %484 = vmatpush3.bf16.xpose.msra.mxu0 %v481_v18 }
  0x24   :  { %526 = vmatprep.subr.bf16.mxu1 %v525_v24  ;;  %486 = vmatprep.subr.bf16.mxu0 %v485_v27 }
  0x27   :  { %528 = vmatpush3.bf16.msra.mxu1 %v525_v24 }
  0x28   :  { %530 = vmatprep.subr.bf16.mxu1 %v529_v28 }
  0x2b   :  { %532 = vmatpush3.bf16.msra.mxu1 %v529_v28  ;;  %488 = vmatpush3.bf16.xpose.msra.mxu0 %v485_v27 }
  0x2c   :  { %534 = vmatprep.subr.bf16.mxu1 %v533_v33  ;;  %490 = vmatprep.subr.bf16.mxu0 %v489_v36 }
  0x2f   :  { %536 = vmatpush3.bf16.msra.mxu1 %v533_v33 }
  0x30   :  { %538 = vmatprep.subr.bf16.mxu1 %v537_v37 }
  0x33   :  { %540 = vmatpush3.bf16.msra.mxu1 %v537_v37  ;;  %492 = vmatpush3.bf16.xpose.msra.mxu0 %v489_v36 }
  0x34   :  { %494 = vmatprep.subr.bf16.mxu0 %v493_v40  ;;  %472 = vmatprep.subr.mxu1 %v246_v51 }
  0x36   :  { %470 = vmatmul.mubr.f32.vlgmr.msra.gmra.mrb[0].mxu1 %v45_v41 }
  0x37   :  { %473 = vmatpush3.msra.mxu1 %v246_v51 }
  0x3b   :  { %496 = vmatpush3.bf16.xpose.msra.mxu0 %v493_v40 }
  0x3c   :  { %498 = vmatprep.subr.bf16.mxu0 %v497_v44 }
  0x43   :  { %500 = vmatpush3.bf16.xpose.msra.mxu0 %v497_v44 }
  0x44   :  { %502 = vmatprep.subr.bf16.mxu0 %v501_v47 }
  0x4b   :  { %504 = vmatpush3.bf16.xpose.msra.mxu0 %v501_v47 }
  0x4c   :  { %506 = vmatprep.subr.bf16.mxu0 %v505_v50 }
  0x53   :  { %508 = vmatpush3.bf16.xpose.msra.mxu0 %v505_v50 }
  0x5a   :  { %435 = vmatmul.mubr.f32.vlgmr.msra.gmra.mrb[0].mxu0 %v45_v41 }
 0x109   :  { %v471_v54 = vpop.f32.mrb[0].mxu1 }
 0x10a   :  { %v237_v55 = vadd.f32 %v471_v54, %v144_v52  ;;  %v227_v56 = vpop.f32.mrb[1].mxu1 }
 0x10b   :  { %v236_v57 = vadd.f32 %v227_v56, %v143_v53 }
 0x10c   :  { %240 = vst.msk [vmem:[#allocation3 + $0x8] sm:$0xff] %vm41_vm0, %v237_v55 }
 0x10d   :  { %239 = vst.msk [vmem:[#allocation3] sm:$0xff] %vm41_vm0, %v236_v57 }
 0x113   :  { %v245_v59 = vld [vmem:[#allocation3 + $0x8] sm:$0xff] }
 0x114   :  { %v244_v58 = vld [vmem:[#allocation3] sm:$0xff] }
 0x115   :  { %474 = vmatprep.mubr.msk.f32.mxu1 %vm41_vm0, %v244_v58 }
 0x116   :  { %475 = vmatmul.mubr.msk.f32.vlgmr.msra.gmra.mrb[2].mxu1 %vm41_vm0, %v245_v59 }
 0x12d   :  { %v436_v60 = vpop.f32.mrb[0].mxu0 }
 0x12e   :  { %v130_v61 = vpop.f32.mrb[1].mxu0 }
 0x1e9   :  { %v476_v62 = vpop.f32.mrb[2].mxu1 }
 0x1ea   :  { %v331_v0 = vadd.f32 %v476_v62, %v436_v60  ;;  %v319_v1 = vpop.f32.mrb[3].mxu1 }
 0x1eb   :  { %v330_v2 = vadd.f32 %v319_v1, %v130_v61 }
 0x1ec   :  { %v340_v3 = vadd.f32 %v362_v63, %v331_v0 }
 0x1ed   :  { %v339_v4 = vadd.f32 %v362_v63, %v330_v2 }
 0x1ee   :  { %342 = vst [vmem:[#allocation7 + $0x8] sm:$0xff] %v340_v3 }
 0x1ef   :  { %341 = vst [vmem:[#allocation7] sm:$0xff] %v339_v4 }
 0x1f0   :  { %581 = shalt.err (!%p578_p12)
}
 0x1f1   :  { %s582_s2 = scalar_lea.hbm %s774_s5, 256 }
 0x1f2   :  { %p583_p13 = scmp.ne.s32.totalorder %s774_s5, %s582_s2  ;;  %p586_p0 = scmp.lt.u32.totalorder %s582_s2, %s774_s5 }
 0x1f4   :  { %p588_p1 = pnand %p586_p0, %p583_p13 }
 0x1f6   :  { %591 = shalt.err (!%p588_p1)
}
 0x1f7   :  { %354 = dma.vmem_to_hbm [thread:$0]  %s349_s24, 256, %s774_s5, [#allocation6], %s597_s28, %s597_s28, %s598_s29  }
 0x1f8   :  { %594 = dma.done.wait [#allocation6], 256  }
 0x1f9   :  { %595 = vsyncadd [#allocation6], 4294967040 }
 0x1fa   :  { %358 = vsyncpa [#allocation5], 1 }
 0x1fb   :  { %359 = vsyncpa [#allocation6], 1 }

</bundles_post_ra>
